<compile_context>
chip_gen: v7x
topology: tpu7x:2x2x1
jax: 0.10.0
libtpu: 0.0.40
codegen_flags: <defaults>
</compile_context>

<pallas_src>
import functools

import jax
import jax.numpy as jnp
from jax.experimental import pallas as pl
from jax.experimental.pallas import tpu as pltpu


_SUBLANE = {4: 8, 2: 16, 1: 32}       # dtype itemsize -> sublane tile rows
_TILE_BYTE_BUDGET = 2 << 20           # per-tile cap; pipelined tiles stay far below scoped VMEM


def _vmem_limit_bytes() -> int:
    """Explicit scoped-VMEM limit: generous but safe on v5e/v6e/v7x."""
    try:
        cap = pltpu.get_tpu_info().vmem_capacity_bytes
    except Exception:  # info query unavailable -> assume the smallest (v7x) VMEM
        cap = 64 * 1024 * 1024
    return max(8 * 1024 * 1024, min(32 * 1024 * 1024, cap // 2))


# --------------------------------------------------------------------------
# Hot path: ring-buffer write (O(S*C) HBM traffic per decode step)
# --------------------------------------------------------------------------
def _ring_write_kernel(pos_ref, sample_ref, cache_ref, out_ref, copy_sem):
    """out aliases cache (HBM).  Write the S new rows at row offset pos.

    Pure HBM->HBM DMA: no VMEM staging, no VALU/MXU work.  Rows outside
    [pos, pos+S) keep their previous values because `out` is literally the
    same HBM buffer as the donated `cache` input.
    """
    del cache_ref                                    # aliased with out_ref; never read
    seq = sample_ref.shape[0]                        # static
    start = pos_ref[0]                               # dynamic row offset (SMEM scalar)
    copy = pltpu.make_async_copy(
        sample_ref, out_ref.at[pl.ds(start, seq), :], copy_sem)
    copy.start()
    copy.wait()


@functools.partial(jax.jit, donate_argnums=(0,))
def ring_cache_write(cache: jax.Array, sample: jax.Array, pos) -> jax.Array:
    """Write `sample` into the ring cache at row offset `pos`, in place.

    Contract: sample.shape[0] divides cache.shape[0] and `pos` advances in
    multiples of sample.shape[0], so a single write never wraps around.
    """
    T, C = cache.shape
    S, Cs = sample.shape
    assert Cs == C and 1 <= S <= T
    assert T % S == 0, "ring cache length must be a multiple of the sample length"
    sample = sample.astype(cache.dtype)              # DMA cannot convert dtypes
    pos_arr = jnp.asarray(pos, jnp.int32).reshape(1)

    return pl.pallas_call(
        _ring_write_kernel,
        out_shape=jax.ShapeDtypeStruct((T, C), cache.dtype),
        in_specs=[
            pl.BlockSpec(memory_space=pltpu.MemorySpace.SMEM),   # pos (scalar)
            pl.BlockSpec(memory_space=pl.ANY),                   # sample (stays in HBM)
            pl.BlockSpec(memory_space=pl.ANY),                   # cache  (HBM, aliased)
        ],
        out_specs=pl.BlockSpec(memory_space=pl.ANY),
        scratch_shapes=[pltpu.SemaphoreType.DMA],
        input_output_aliases={2: 0},                 # cache -> out: in-place update
    )(pos_arr, sample, cache)


# --------------------------------------------------------------------------
# Materialization: time-ordered view of the ring (only when needed)
# --------------------------------------------------------------------------
def _ring_to_linear_kernel(pos_blk_ref, ring_ref, out_ref):
    del pos_blk_ref                                  # consumed by the index maps
    out_ref[...] = ring_ref[...]


@functools.partial(jax.jit, static_argnames=("row_block",))
def ring_to_linear(ring: jax.Array, pos, *, row_block: int) -> jax.Array:
    """Materialize the time-ordered cache: out[t, :] = ring[(pos + t) % T, :].

    `pos` must be a multiple of `row_block` (it is: the model advances the
    write offset by the sample length and passes row_block = sample length).
    """
    T, C = ring.shape
    itemsize = jnp.dtype(ring.dtype).itemsize
    sublane = _SUBLANE.get(itemsize, 8)
    assert T % row_block == 0
    assert row_block == T or row_block % sublane == 0, (
        "row_block must be a sublane-tile multiple for unmasked stores")

    # Byte-budgeted tiles; only split channels in 128-lane-aligned halves.
    col_block = C
    while (row_block * col_block * itemsize > _TILE_BYTE_BUDGET
           and col_block % 256 == 0):
        col_block //= 2
    n_row_blocks = T // row_block
    n_col_blocks = C // col_block

    pos_blk = (jnp.asarray(pos, jnp.int32) // row_block).reshape(1)

    return pl.pallas_call(
        _ring_to_linear_kernel,
        out_shape=jax.ShapeDtypeStruct((T, C), ring.dtype),
        grid_spec=pltpu.PrefetchScalarGridSpec(
            num_scalar_prefetch=1,
            grid=(n_row_blocks, n_col_blocks),
            in_specs=[pl.BlockSpec(
                (row_block, col_block),
                lambda i, j, p: ((i + p[0]) % n_row_blocks, j))],
            out_specs=pl.BlockSpec(
                (row_block, col_block), lambda i, j, p: (i, j)),
        ),
        compiler_params=pltpu.CompilerParams(
            # Fresh (non-aliased) output: every block is independent, so both
            # axes can be split across TensorCores (2x on v7x's megacore).
            dimension_semantics=("parallel", "parallel"),
            vmem_limit_bytes=_vmem_limit_bytes(),
        ),
    )(pos_blk, ring)


# --------------------------------------------------------------------------
# Minimal JAX mirror of the PyTorch BaseModel surface
# --------------------------------------------------------------------------
class BaseModelJAX:
    """The persistent cache is a ring buffer + scalar write offset; the
    time-ordered view (torch's self._cache contents) is materialized lazily."""

    def __init__(self, tag: str = "base", precision=jnp.float32,
                 cache_len: int = 64, channels: int = 128,
                 sample_len: int = 8) -> None:
        assert cache_len % sample_len == 0
        self._n_channels = 2                       # mirrors the torch attribute
        self._precision = precision
        self._tb_path = f"runs/{tag}"              # bookkeeping only, never written
        self._sample_len = sample_len
        self._cache_ring = jnp.zeros((cache_len, channels), dtype=precision)
        self._write_pos = 0                        # rows; always a multiple of sample_len

    @property
    def channels(self) -> int:
        return self._n_channels

    @property
    def log_path(self) -> str:
        return self._tb_path

    def forward(self, x):
        raise NotImplementedError   # abstract in the source module as well

    def predict_update(self, sample: jax.Array) -> jax.Array:
        """The tensor math of predict(): append `sample` to the rolling cache.

        O(S*C) HBM traffic per call (ring write into the donated buffer)
        instead of the torch roll's O(T*C)."""
        seq = sample.shape[0]
        assert seq == self._sample_len
        self._cache_ring = ring_cache_write(
            self._cache_ring, sample.astype(self._precision), self._write_pos)
        self._write_pos = (self._write_pos + seq) % self._cache_ring.shape[0]
        return self._cache_ring

    def linear_cache(self) -> jax.Array:
        """Time-ordered (oldest -> newest) cache, i.e. torch's self._cache."""
        return ring_to_linear(self._cache_ring, self._write_pos,
                              row_block=self._sample_len)


if __name__ == "__main__":
    key = jax.random.PRNGKey(0)
    k1, k2, k3, k4, k5 = jax.random.split(key, 5)

    def torch_cache_update(linear_cache, sample):
        seq = sample.shape[0]
        return jnp.roll(linear_cache, -seq, axis=0).at[-seq:, :].set(sample)

    # ---- config 1: streaming predict() steps (small, sublane/lane aligned) ----
    T, C, S = 64, 128, 8
    cache0 = jax.random.normal(k1, (T, C), dtype=jnp.float32)
    s1 = jax.random.normal(k2, (S, C), dtype=jnp.float32)
    s2 = jax.random.normal(k3, (S, C), dtype=jnp.float32)

    # Pure-JAX references (computed and materialized BEFORE the donating calls).
    ref1 = torch_cache_update(cache0, s1)
    ref2 = torch_cache_update(ref1, s2)
    ref1, ref2 = jax.block_until_ready((ref1, ref2))

    model = BaseModelJAX(tag="pallas_base", cache_len=T, channels=C, sample_len=S)
    model._cache_ring = cache0           # seed the ring; write offset stays 0
    model.predict_update(s1)
    out1 = jax.block_until_ready(model.linear_cache())
    assert out1.shape == (T, C) and out1.dtype == jnp.float32
    assert bool(jnp.array_equal(out1, ref1))

    model.predict_update(s2)
    out2 = jax.block_until_ready(model.linear_cache())
    assert bool(jnp.array_equal(out2, ref2))

    # ---- config 2: exercise wrap-around of the write offset + wider channels ----
    T2, C2, S2 = 64, 256, 32
    ring = jax.random.normal(k4, (T2, C2), dtype=jnp.float32)
    ref = ring
    pos = 0
    for step in range(3):                # pos: 0 -> 32 -> 0 (wrap) -> 32
        smp = jax.random.normal(jax.random.fold_in(k5, step), (S2, C2), jnp.float32)
        ref = jax.block_until_ready(torch_cache_update(ref, smp))
        ring = ring_cache_write(ring, smp, pos)
        pos = (pos + S2) % T2
        lin = jax.block_until_ready(ring_to_linear(ring, pos, row_block=S2))
        assert bool(jnp.array_equal(lin, ref))

    print("KERNEL_OK")
</pallas_src>

<mosaic_0001>
module attributes {stable_mosaic.version = 11 : i64} {
  func.func @_ring_write_kernel(%arg0: memref<1xi32, #tpu.memory_space<smem>>, %arg1: memref<8x128xf32, #tpu.memory_space<any>>, %arg2: memref<64x128xf32, #tpu.memory_space<any>>, %arg3: memref<64x128xf32, #tpu.memory_space<any>>, %arg4: memref<!tpu.dma_semaphore, #tpu.memory_space<semaphore_mem>>) attributes {dimension_semantics = [], scalar_prefetch = 0 : i64, scratch_operands = 1 : i64, tpu.core_type = #tpu.core_type<tc>} {
    %c0 = arith.constant 0 : index
    %0 = memref.load %arg0[%c0] : memref<1xi32, #tpu.memory_space<smem>>
    %c0_i32 = arith.constant 0 : i32
    %1 = tpu.memref_slice %arg3[%0, %c0_i32] : memref<64x128xf32, #tpu.memory_space<any>> -> memref<8x128xf32, #tpu.memory_space<any>>
    tpu.enqueue_dma source(%arg1 : memref<8x128xf32, #tpu.memory_space<any>>) target(%1 : memref<8x128xf32, #tpu.memory_space<any>>) target_semaphore(%arg4 : memref<!tpu.dma_semaphore, #tpu.memory_space<semaphore_mem>>)
    %c0_i32_0 = arith.constant 0 : i32
    %2 = tpu.memref_slice %arg3[%0, %c0_i32_0] : memref<64x128xf32, #tpu.memory_space<any>> -> memref<8x128xf32, #tpu.memory_space<any>>
    tpu.wait_dma2 semaphore(%arg4 : memref<!tpu.dma_semaphore, #tpu.memory_space<semaphore_mem>>) src(%arg1 : memref<8x128xf32, #tpu.memory_space<any>>) dst(%2 : memref<8x128xf32, #tpu.memory_space<any>>)
    return
  }
}

</mosaic_0001>

<bundles_post_ra>
// kernel: ring_cache_write.1
= control target key start
LH: loop header
LB: loop body
LE: loop exit
PB: predicated region body
PF: predicated region fallthrough
CT: control target
= control target key end

     0   :  { %s99_s0 = inlined_call_operand.<no memory space> [shape: s32[1], index: 0, kind: input, shape index: {}]   ;;  %s100_s1 = inlined_call_operand.vmem [shape: f32[8,128], index: 1, kind: input, shape index: {}]   ;;  %s101_s2 = inlined_call_operand.hbm [shape: f32[64,128], index: 2, kind: input, shape index: {}, may-alias: {2,3}]   ;;  %s102_s3 = inlined_call_operand.hbm [shape: f32[64,128], index: 3, kind: output, shape index: {}, may-alias: {2,3}]  }
   0x1   :  { %s36_s14 = sshll.u32 %s99_s0, 4  ;;  %s21_s17 = sshll.u32 %s100_s1, 4  ;;  %s22_s17 = int_to_ptr.vmem [resolvable:$true] %s21_s17 }
   0x2   :  { %s13_s20 = scalar_lea.hbm %s102_s3, %s36_s14  ;;  %s38_s21 = scalar_lea.vmem %s22_s17, 128 }
   0x3   :  { %p39_p0 = scmp.ne.s32.totalorder %s22_s17, %s38_s21  ;;  %p43_p1 = scmp.lt.s32.totalorder %s22_s17, %s22_s17 }
   0x4   :  { %p44_p2 = scmp.lt.s32.totalorder %s38_s21, %s38_s21 }
   0x6   :  { %p45_p3 = por %p44_p2, %p43_p1 }
   0x8   :  { %p46_p4 = pnand %p45_p3, %p39_p0 }
   0xa   :  { %49 = shalt.err (!%p46_p4)  }
   0xb   :  { %s50_s2 = scalar_lea.hbm %s13_s20, 128  ;;  %s52_s23 = scalar_lea.hbm %s102_s3, 1024 }
   0xc   :  { %p51_p5 = scmp.ne.s32.totalorder %s13_s20, %s50_s2  ;;  %p53_p6 = scmp.lt.u32.totalorder %s13_s20, %s102_s3 }
   0xd   :  { %p54_p7 = scmp.lt.u32.totalorder %s52_s23, %s50_s2  ;;  %p56_p9 = scmp.lt.u32.totalorder %s50_s2, %s13_s20 }
   0xf   :  { %p55_p8 = por %p54_p7, %p53_p6 }
  0x11   :  { %p57_p10 = por %p56_p9, %p55_p8 }
  0x13   :  { %p58_p11 = pnand %p57_p10, %p51_p5 }
  0x15   :  { %61 = shalt.err (!%p58_p11)  }
  0x16   :  { %24 = dma.vmem_to_hbm [thread:$0]  %s22_s17, 128, %s13_s20, [#allocation2] }
  0x17   :  { %62 = dma.done.wait [#allocation2], 128 }
  0x18   :  { %63 = vsyncadd [#allocation2], 4294967168 }
  0x19   :  { %28 = vsyncmov [#allocation2] }
  0x1c   :  { %s29_s25 = vpop.sfrf %28 }
  0x1d   :  { %p37_p12 = scmp.ne.s32.totalorder %s29_s25, 0 }
  0x1f   :  { %33 = shalt.err (%p37_p12)  }

</bundles_post_ra>
